<compile_context>
chip_gen: v7x
topology: tpu7x:2x2x1
jax: 0.10.0
libtpu: 0.0.40
codegen_flags: <defaults>
</compile_context>

<pallas_src>
import math

import jax
import jax.numpy as jnp
from jax import lax
from jax.experimental import pallas as pl
from jax.experimental.pallas import tpu as pltpu


def _psi_kernel(a_ref, bc_ref, psi2t_ref, out_ref):
    # a_ref:     (block_i, LH)          A_rep tile, depends on i only, (l,h) lane-packed
    # bc_ref:    (block_j, LH)          B[j,h] + C[l,h], (l,h) lane-packed
    # psi2t_ref: (L, LH)                psi2t[l', l*Hp+h] = psi_2[h] * (l == l')
    # out_ref:   (block_i, L, block_j)  psi[i, l, j] for this (i, j) tile
    block_i = a_ref.shape[0]

    bc = bc_ref[...]          # resident across the i-row loop
    psi2t = psi2t_ref[...]
    # Contract the lane (l,h) axes of both operands:  psi2t (L,LH) @ t_i^T (LH,block_j).
    dn = (((1,), (1,)), ((), ()))

    def row(i, carry):
        a_i = a_ref[pl.ds(i, 1), :]                 # (1, LH): row i of the A tile
        # Broadcast-add + tanh on full 128-lane vregs; only (block_j, LH) is ever live.
        t_i = jnp.tanh(a_i + bc)                    # (block_j, LH)   -> EUP
        # Single 2-D MXU contraction; result is lane-dense (block_j on lanes).
        r_i = lax.dot_general(
            psi2t, t_i, dn, preferred_element_type=jnp.float32
        )                                           # (L, block_j)
        out_ref[i] = r_i                            # lane-dense store of one i-row slab
        return carry

    if block_i <= 16:
        # Short, fixed trip count: fully static indices (zero dynamic-slice overhead).
        for i in range(block_i):
            row(i, 0)
    else:
        lax.fori_loop(0, block_i, row, 0)


def _pick_tile(P, align, cap):
    """Largest divisor of P that is a multiple of `align` and <= cap, preferring >= 2
    tiles (so megacore / v7x has work for both TensorCores). Falls back to P."""
    cands = [d for d in range(align, min(P, cap) + 1, align) if P % d == 0]
    multi = [d for d in cands if P // d >= 2]
    if multi:
        return max(multi)
    if cands:
        return max(cands)
    return P


def mrf_nn_forward(pos, labs, W, psi_2, *, block_i=None, block_j=None, out_layout="ijl"):
    """pos: (P, n), labs: (L, n), W: (3n, H), psi_2: (H,)  ->  psi.

    out_layout="ijl" (default): returns (P, P, L), matching the PyTorch module.
    out_layout="ilj": returns the kernel-native (P, L, P) layout (no final transpose),
    recommended for large P when the consumer can take it.
    """
    P, n = pos.shape
    L = labs.shape[0]
    H = W.shape[1]
    assert W.shape[0] == 3 * n

    f32 = jnp.float32
    hi = lax.Precision.HIGHEST
    pos = pos.astype(f32)
    labs = labs.astype(f32)
    W = W.astype(f32)
    psi_2 = psi_2.astype(f32)

    # --- algebraic factoring of the concat-matmul (psi_1 is never built) ---
    W1, W2, W3 = W[:n], W[n:2 * n], W[2 * n:]
    A = jnp.dot(pos, W1, precision=hi)     # (P, H)  depends on i
    B = jnp.dot(pos, W2, precision=hi)     # (P, H)  depends on j
    C = jnp.dot(labs, W3, precision=hi)    # (L, H)  depends on l

    # --- pad H so the packed (l, h) lane dim is a multiple of 128 (full-lane vregs) ---
    step = 128 // math.gcd(L, 128)
    Hp = ((H + step - 1) // step) * step
    if Hp != H:
        padw = ((0, 0), (0, Hp - H))
        A = jnp.pad(A, padw)
        B = jnp.pad(B, padw)
        C = jnp.pad(C, padw)
        psi2_p = jnp.pad(psi_2, (0, Hp - H))
    else:
        psi2_p = psi_2
    LH = L * Hp
    assert LH % 128 == 0, "packed (l,h) lane dim must be a multiple of 128"

    # Pack (l, h) along lanes.
    A_rep = jnp.tile(A, (1, L))                          # A_rep[i, l*Hp+h] = A[i, h]
    BC = jnp.tile(B, (1, L)) + C.reshape(1, LH)          # BC[j, l*Hp+h]   = B[j,h]+C[l,h]
    # psi2t[l', l*Hp+h] = psi_2[h] * (l == l')  -> segmented h-reduction as one matmul.
    psi2t = jnp.kron(jnp.eye(L, dtype=f32), psi2_p.reshape(1, Hp))     # (L, LH)

    # --- tile selection ---
    if block_i is None:
        block_i = _pick_tile(P, 8, 256)       # >=2 tiles when possible (megacore), <=256
    if block_j is None:
        block_j = _pick_tile(P, 128, 2048)    # output lane dim: multiple of 128 or full
    assert P % block_i == 0 and (block_i == P or block_i % 8 == 0), "bad i-tile"
    assert P % block_j == 0 and (block_j == P or block_j % 128 == 0), "bad j-tile"
    grid = (P // block_i, P // block_j)

    # --- explicit VMEM budget (double-buffered tiles + live per-row intermediates) ---
    step_bytes = 4 * (2 * block_i * LH + 2 * block_j * LH + 2 * L * LH
                      + 2 * block_i * L * block_j      # out block, double buffered
                      + 2 * block_j * LH                # live tanh row + slack
                      + 2 * L * block_j)
    vmem_limit = int(min(max(2 * step_bytes, 32 * 1024 * 1024), 64 * 1024 * 1024))

    cost = pl.CostEstimate(
        flops=2 * P * P * L * LH,              # psi2t contraction
        transcendentals=P * P * LH,            # tanh
        bytes_accessed=4 * (P * P * L + 2 * P * LH + L * LH),
    )

    out_ilj = pl.pallas_call(
        _psi_kernel,
        out_shape=jax.ShapeDtypeStruct((P, L, P), f32),
        grid_spec=pltpu.PrefetchScalarGridSpec(
            num_scalar_prefetch=0,
            grid=grid,
            in_specs=[
                pl.BlockSpec((block_i, LH), lambda i, j: (i, 0)),   # A tile over i
                pl.BlockSpec((block_j, LH), lambda i, j: (j, 0)),   # BC tile over j
                pl.BlockSpec((L, LH), lambda i, j: (0, 0)),         # psi2t resident
            ],
            out_specs=pl.BlockSpec((block_i, L, block_j), lambda i, j: (i, 0, j)),
        ),
        compiler_params=pltpu.CompilerParams(
            dimension_semantics=("parallel", "parallel"),
            vmem_limit_bytes=vmem_limit,
        ),
        cost_estimate=cost,
    )(A_rep, BC, psi2t)

    if out_layout == "ilj":
        return out_ilj
    # TODO(synk): MRF(self.model, self.sentence)(psi) calls Model.log_prob, but the Model
    # class / sentence structure are not defined in the source; returning the neural psi
    # potentials (the actual compute of MRF_NN.forward).
    return jnp.transpose(out_ilj, (0, 2, 1))   # (P, P, L), matching the module layout


def _reference(pos, labs, W, psi_2):
    # Pure-JAX reference mirroring the PyTorch repeat/cat/tensordot sequence.
    hi = lax.Precision.HIGHEST
    P, n = pos.shape
    L = labs.shape[0]
    pos1 = jnp.broadcast_to(pos[:, None, None, :], (P, P, L, n))
    pos2 = jnp.broadcast_to(pos[None, :, None, :], (P, P, L, n))
    lab = jnp.broadcast_to(labs[None, None, :, :], (P, P, L, n))
    psi_1 = jnp.concatenate([pos1, pos2, lab], axis=-1)
    h = jnp.tanh(jnp.tensordot(psi_1, W, 1, precision=hi))
    return jnp.tensordot(h, psi_2, 1, precision=hi)


if __name__ == "__main__":
    key = jax.random.PRNGKey(0)
    k1, k2, k3, k4 = jax.random.split(key, 4)

    # Small shapes implied by the forward: P pos tags, L labels, n embedding dim,
    # H hidden width of W (L*H = 128 -> full-lane packing, no padding needed).
    P, L, n, H = 6, 4, 8, 32

    pos = jax.random.normal(k1, (P, n), dtype=jnp.float32)
    labs = jax.random.normal(k2, (L, n), dtype=jnp.float32)
    W = 0.1 * jax.random.normal(k3, (3 * n, H), dtype=jnp.float32)
    psi_2 = 0.1 * jax.random.normal(k4, (H,), dtype=jnp.float32)

    psi = jax.block_until_ready(mrf_nn_forward(pos, labs, W, psi_2))
    psi_ref = _reference(pos, labs, W, psi_2)
    assert psi.shape == (P, P, L)
    assert jnp.allclose(psi, psi_ref, atol=1e-5, rtol=1e-5), (
        "Pallas psi does not match reference (toy, single-step)"
    )

    # Exercise the gridded path: 2 i-tiles (megacore sharding), 8-aligned tile.
    P2 = 16
    pos_big = jax.random.normal(jax.random.PRNGKey(1), (P2, n), dtype=jnp.float32)
    psi_big = jax.block_until_ready(
        mrf_nn_forward(pos_big, labs, W, psi_2, block_i=8)
    )
    psi_big_ref = _reference(pos_big, labs, W, psi_2)
    assert psi_big.shape == (P2, P2, L)
    assert jnp.allclose(psi_big, psi_big_ref, atol=1e-5, rtol=1e-5), (
        "Pallas psi does not match reference (gridded)"
    )

    print("KERNEL_OK")
</pallas_src>

<mosaic_0001>
module attributes {stable_mosaic.version = 11 : i64} {
  func.func @_psi_kernel(%arg0: i32, %arg1: i32, %arg2: memref<6x128xf32, #tpu.memory_space<vmem>>, %arg3: memref<6x128xf32, #tpu.memory_space<vmem>>, %arg4: memref<4x128xf32, #tpu.memory_space<vmem>>, %arg5: memref<6x4x6xf32, #tpu.memory_space<vmem>>) attributes {dimension_semantics = [#tpu.dimension_semantics<parallel>, #tpu.dimension_semantics<parallel>], iteration_bounds = array<i64: 1, 1>, scalar_prefetch = 0 : i64, scratch_operands = 0 : i64, tpu.core_type = #tpu.core_type<tc>, window_params = [{transform_indices = @transform_0, window_bounds = array<i64: 6, 128>}, {transform_indices = @transform_1, window_bounds = array<i64: 6, 128>}, {pipeline_mode = #tpu.pipeline_mode<synchronous>, transform_indices = @transform_2, window_bounds = array<i64: 4, 128>}, {transform_indices = @transform_3, window_bounds = array<i64: 6, 4, 6>}]} {
    %c0 = arith.constant 0 : index
    %c0_0 = arith.constant 0 : index
    %0 = vector.load %arg3[%c0, %c0_0] : memref<6x128xf32, #tpu.memory_space<vmem>>, vector<6x128xf32>
    %c0_1 = arith.constant 0 : index
    %c0_2 = arith.constant 0 : index
    %1 = vector.load %arg4[%c0_1, %c0_2] : memref<4x128xf32, #tpu.memory_space<vmem>>, vector<4x128xf32>
    %c0_3 = arith.constant 0 : index
    %c0_4 = arith.constant 0 : index
    %2 = vector.load %arg2[%c0_3, %c0_4] : memref<6x128xf32, #tpu.memory_space<vmem>>, vector<1x128xf32>
    %3 = vector.broadcast %2 : vector<1x128xf32> to vector<6x128xf32>
    %4 = arith.addf %3, %0 : vector<6x128xf32>
    %5 = math.tanh %4 : vector<6x128xf32>
    %cst = arith.constant dense<0.000000e+00> : vector<4x6xf32>
    %6 = tpu.matmul %1, %5, %cst {dimension_numbers = #tpu.dot_dimension_numbers<[1], [1], [0], [0], [0, 0, 1, 0], [], []>} : vector<4x128xf32>, vector<6x128xf32>, vector<4x6xf32> -> vector<4x6xf32>
    %c0_5 = arith.constant 0 : index
    %c0_6 = arith.constant 0 : index
    %c0_7 = arith.constant 0 : index
    %7 = vector.load %arg5[%c0_5, %c0_6, %c0_7] : memref<6x4x6xf32, #tpu.memory_space<vmem>>, vector<1x4x6xf32>
    %8 = vector.shape_cast %7 : vector<1x4x6xf32> to vector<4x6xf32>
    %9 = vector.shape_cast %6 : vector<4x6xf32> to vector<1x4x6xf32>
    tpu.vector_store %arg5[%c0_5, %c0_6, %c0_7], %9 {strides = array<i32>} : memref<6x4x6xf32, #tpu.memory_space<vmem>>, vector<1x4x6xf32>,
    %c1 = arith.constant 1 : index
    %c0_8 = arith.constant 0 : index
    %10 = vector.load %arg2[%c1, %c0_8] : memref<6x128xf32, #tpu.memory_space<vmem>>, vector<1x128xf32>
    %11 = vector.broadcast %10 : vector<1x128xf32> to vector<6x128xf32>
    %12 = arith.addf %11, %0 : vector<6x128xf32>
    %13 = math.tanh %12 : vector<6x128xf32>
    %cst_9 = arith.constant dense<0.000000e+00> : vector<4x6xf32>
    %14 = tpu.matmul %1, %13, %cst_9 {dimension_numbers = #tpu.dot_dimension_numbers<[1], [1], [0], [0], [0, 0, 1, 0], [], []>} : vector<4x128xf32>, vector<6x128xf32>, vector<4x6xf32> -> vector<4x6xf32>
    %c1_10 = arith.constant 1 : index
    %c0_11 = arith.constant 0 : index
    %c0_12 = arith.constant 0 : index
    %15 = vector.load %arg5[%c1_10, %c0_11, %c0_12] : memref<6x4x6xf32, #tpu.memory_space<vmem>>, vector<1x4x6xf32>
    %16 = vector.shape_cast %15 : vector<1x4x6xf32> to vector<4x6xf32>
    %17 = vector.shape_cast %14 : vector<4x6xf32> to vector<1x4x6xf32>
    tpu.vector_store %arg5[%c1_10, %c0_11, %c0_12], %17 {strides = array<i32>} : memref<6x4x6xf32, #tpu.memory_space<vmem>>, vector<1x4x6xf32>,
    %c2 = arith.constant 2 : index
    %c0_13 = arith.constant 0 : index
    %18 = vector.load %arg2[%c2, %c0_13] : memref<6x128xf32, #tpu.memory_space<vmem>>, vector<1x128xf32>
    %19 = vector.broadcast %18 : vector<1x128xf32> to vector<6x128xf32>
    %20 = arith.addf %19, %0 : vector<6x128xf32>
    %21 = math.tanh %20 : vector<6x128xf32>
    %cst_14 = arith.constant dense<0.000000e+00> : vector<4x6xf32>
    %22 = tpu.matmul %1, %21, %cst_14 {dimension_numbers = #tpu.dot_dimension_numbers<[1], [1], [0], [0], [0, 0, 1, 0], [], []>} : vector<4x128xf32>, vector<6x128xf32>, vector<4x6xf32> -> vector<4x6xf32>
    %c2_15 = arith.constant 2 : index
    %c0_16 = arith.constant 0 : index
    %c0_17 = arith.constant 0 : index
    %23 = vector.load %arg5[%c2_15, %c0_16, %c0_17] : memref<6x4x6xf32, #tpu.memory_space<vmem>>, vector<1x4x6xf32>
    %24 = vector.shape_cast %23 : vector<1x4x6xf32> to vector<4x6xf32>
    %25 = vector.shape_cast %22 : vector<4x6xf32> to vector<1x4x6xf32>
    tpu.vector_store %arg5[%c2_15, %c0_16, %c0_17], %25 {strides = array<i32>} : memref<6x4x6xf32, #tpu.memory_space<vmem>>, vector<1x4x6xf32>,
    %c3 = arith.constant 3 : index
    %c0_18 = arith.constant 0 : index
    %26 = vector.load %arg2[%c3, %c0_18] : memref<6x128xf32, #tpu.memory_space<vmem>>, vector<1x128xf32>
    %27 = vector.broadcast %26 : vector<1x128xf32> to vector<6x128xf32>
    %28 = arith.addf %27, %0 : vector<6x128xf32>
    %29 = math.tanh %28 : vector<6x128xf32>
    %cst_19 = arith.constant dense<0.000000e+00> : vector<4x6xf32>
    %30 = tpu.matmul %1, %29, %cst_19 {dimension_numbers = #tpu.dot_dimension_numbers<[1], [1], [0], [0], [0, 0, 1, 0], [], []>} : vector<4x128xf32>, vector<6x128xf32>, vector<4x6xf32> -> vector<4x6xf32>
    %c3_20 = arith.constant 3 : index
    %c0_21 = arith.constant 0 : index
    %c0_22 = arith.constant 0 : index
    %31 = vector.load %arg5[%c3_20, %c0_21, %c0_22] : memref<6x4x6xf32, #tpu.memory_space<vmem>>, vector<1x4x6xf32>
    %32 = vector.shape_cast %31 : vector<1x4x6xf32> to vector<4x6xf32>
    %33 = vector.shape_cast %30 : vector<4x6xf32> to vector<1x4x6xf32>
    tpu.vector_store %arg5[%c3_20, %c0_21, %c0_22], %33 {strides = array<i32>} : memref<6x4x6xf32, #tpu.memory_space<vmem>>, vector<1x4x6xf32>,
    %c4 = arith.constant 4 : index
    %c0_23 = arith.constant 0 : index
    %34 = vector.load %arg2[%c4, %c0_23] : memref<6x128xf32, #tpu.memory_space<vmem>>, vector<1x128xf32>
    %35 = vector.broadcast %34 : vector<1x128xf32> to vector<6x128xf32>
    %36 = arith.addf %35, %0 : vector<6x128xf32>
    %37 = math.tanh %36 : vector<6x128xf32>
    %cst_24 = arith.constant dense<0.000000e+00> : vector<4x6xf32>
    %38 = tpu.matmul %1, %37, %cst_24 {dimension_numbers = #tpu.dot_dimension_numbers<[1], [1], [0], [0], [0, 0, 1, 0], [], []>} : vector<4x128xf32>, vector<6x128xf32>, vector<4x6xf32> -> vector<4x6xf32>
    %c4_25 = arith.constant 4 : index
    %c0_26 = arith.constant 0 : index
    %c0_27 = arith.constant 0 : index
    %39 = vector.load %arg5[%c4_25, %c0_26, %c0_27] : memref<6x4x6xf32, #tpu.memory_space<vmem>>, vector<1x4x6xf32>
    %40 = vector.shape_cast %39 : vector<1x4x6xf32> to vector<4x6xf32>
    %41 = vector.shape_cast %38 : vector<4x6xf32> to vector<1x4x6xf32>
    tpu.vector_store %arg5[%c4_25, %c0_26, %c0_27], %41 {strides = array<i32>} : memref<6x4x6xf32, #tpu.memory_space<vmem>>, vector<1x4x6xf32>,
    %c5 = arith.constant 5 : index
    %c0_28 = arith.constant 0 : index
    %42 = vector.load %arg2[%c5, %c0_28] : memref<6x128xf32, #tpu.memory_space<vmem>>, vector<1x128xf32>
    %43 = vector.broadcast %42 : vector<1x128xf32> to vector<6x128xf32>
    %44 = arith.addf %43, %0 : vector<6x128xf32>
    %45 = math.tanh %44 : vector<6x128xf32>
    %cst_29 = arith.constant dense<0.000000e+00> : vector<4x6xf32>
    %46 = tpu.matmul %1, %45, %cst_29 {dimension_numbers = #tpu.dot_dimension_numbers<[1], [1], [0], [0], [0, 0, 1, 0], [], []>} : vector<4x128xf32>, vector<6x128xf32>, vector<4x6xf32> -> vector<4x6xf32>
    %c5_30 = arith.constant 5 : index
    %c0_31 = arith.constant 0 : index
    %c0_32 = arith.constant 0 : index
    %47 = vector.load %arg5[%c5_30, %c0_31, %c0_32] : memref<6x4x6xf32, #tpu.memory_space<vmem>>, vector<1x4x6xf32>
    %48 = vector.shape_cast %47 : vector<1x4x6xf32> to vector<4x6xf32>
    %49 = vector.shape_cast %46 : vector<4x6xf32> to vector<1x4x6xf32>
    tpu.vector_store %arg5[%c5_30, %c0_31, %c0_32], %49 {strides = array<i32>} : memref<6x4x6xf32, #tpu.memory_space<vmem>>, vector<1x4x6xf32>,
    return
  }
  func.func @transform_0(%arg0: i32, %arg1: i32) -> (i32, i32) {
    %c0_i32 = arith.constant 0 : i32
    %c0_i32_0 = arith.constant 0 : i32
    return %arg0, %c0_i32 : i32, i32
  }
  func.func @transform_1(%arg0: i32, %arg1: i32) -> (i32, i32) {
    %c0_i32 = arith.constant 0 : i32
    %c0_i32_0 = arith.constant 0 : i32
    return %arg1, %c0_i32 : i32, i32
  }
  func.func @transform_2(%arg0: i32, %arg1: i32) -> (i32, i32) {
    %c0_i32 = arith.constant 0 : i32
    %c0_i32_0 = arith.constant 0 : i32
    %c0_i32_1 = arith.constant 0 : i32
    return %c0_i32, %c0_i32_0 : i32, i32
  }
  func.func @transform_3(%arg0: i32, %arg1: i32) -> (i32, i32, i32) {
    %c0_i32 = arith.constant 0 : i32
    %c0_i32_0 = arith.constant 0 : i32
    return %arg0, %c0_i32, %arg1 : i32, i32, i32
  }
}

</mosaic_0001>

<bundles_post_ra>
// kernel: tpu_custom_call.1
= control target key start
LH: loop header
LB: loop body
LE: loop exit
PB: predicated region body
PF: predicated region fallthrough
CT: control target
= control target key end

     0   :  { %8 = vsyncpa [#allocation3], 0  ;;  %s750_s0 = inlined_call_operand.hbm [shape: f32[6,128], index: 0, kind: input, shape index: {}]   ;;  %s751_s1 = inlined_call_operand.hbm [shape: f32[6,128], index: 1, kind: input, shape index: {}]   ;;  %s752_s2 = inlined_call_operand.vmem [shape: f32[4,128], index: 2, kind: input, shape index: {}]   ;;  %s753_s3 = inlined_call_operand.hbm [shape: f32[6,4,6], index: 3, kind: output, shape index: {}]  }
   0x1   :  { %9 = vsyncpa [#allocation6], 0 }
   0x2   :  { %10 = vsyncpa [#allocation4], 0  ;;  %s672_s12 = smov [#allocation2]   ;;  %s673_s14 = smov [#allocation5]  }
   0x3   :  { %s17_s13 = sshll.u32 %s672_s12, 4  ;;  %s27_s15 = sshll.u32 %s673_s14, 4  ;;  %s18_s13 = int_to_ptr.vmem [resolvable:$true] %s17_s13  ;;  %s28_s15 = int_to_ptr.vmem [resolvable:$true] %s27_s15 }
   0x4   :  { %s600_s18 = scalar_lea.hbm %s750_s0, 128 }
   0x5   :  { %p601_p0 = scmp.ne.s32.totalorder %s750_s0, %s600_s18  ;;  %p604_p1 = scmp.lt.u32.totalorder %s600_s18, %s750_s0 }
   0x7   :  { %p606_p2 = pnand %p604_p1, %p601_p0 }
   0x9   :  { %609 = shalt.err (!%p606_p2)
}
   0xa   :  { %s610_s23 = scalar_lea.vmem %s18_s13, 128  ;;  %p615_p4 = scmp.lt.s32.totalorder %s18_s13, %s18_s13 }
   0xb   :  { %p611_p3 = scmp.ne.s32.totalorder %s18_s13, %s610_s23  ;;  %p616_p5 = scmp.lt.s32.totalorder %s610_s23, %s610_s23 }
   0xd   :  { %p617_p6 = por %p616_p5, %p615_p4 }
   0xf   :  { %p618_p7 = pnand %p617_p6, %p611_p3 }
  0x11   :  { %621 = shalt.err (!%p618_p7)
}
  0x12   :  { %20 = dma.hbm_to_vmem [thread:$0]  %s750_s0, 128, %s18_s13, [#allocation3]  }
  0x13   :  { %s622_s28 = scalar_lea.hbm %s751_s1, 128 }
  0x14   :  { %p623_p8 = scmp.ne.s32.totalorder %s751_s1, %s622_s28  ;;  %p626_p9 = scmp.lt.u32.totalorder %s622_s28, %s751_s1 }
  0x16   :  { %p628_p10 = pnand %p626_p9, %p623_p8 }
  0x18   :  { %631 = shalt.err (!%p628_p10)
}
  0x19   :  { %s632_s6 = scalar_lea.vmem %s28_s15, 128  ;;  %p637_p12 = scmp.lt.s32.totalorder %s28_s15, %s28_s15 }
  0x1a   :  { %p633_p11 = scmp.ne.s32.totalorder %s28_s15, %s632_s6  ;;  %p638_p13 = scmp.lt.s32.totalorder %s632_s6, %s632_s6 }
  0x1c   :  { %p639_p0 = por %p638_p13, %p637_p12 }
  0x1e   :  { %p640_p1 = pnand %p639_p0, %p633_p11 }
  0x20   :  { %643 = shalt.err (!%p640_p1)
}
  0x21   :  { %30 = dma.hbm_to_vmem [thread:$0]  %s751_s1, 128, %s28_s15, [#allocation6]  }
  0x22   :  { %666 = dma.done.wait [#allocation3], 128  }
  0x23   :  { %667 = vsyncadd [#allocation3], 4294967168 }
  0x24   :  { %668 = dma.done.wait [#allocation6], 128  }
  0x25   :  { %669 = vsyncadd [#allocation6], 4294967168  ;;  %v674_v0 = vmov 0.0   ;;  %vm675_vm0 = vmmov 0   ;;  %v39_v1 = vld [vmem:[#allocation5] sm:$0x3f] }
  0x26   :  { %551 = vmatprep.subr.mxu0 %v674_v0  ;;  %556 = vmatprep.subr.mxu1 %v674_v0  ;;  %v533_v2 = vld [vmem:[#allocation2] ss:$0 sm:$0xff]  ;;  %v535_v3 = vld [vmem:[#allocation2 + $0x2] ss:$0 sm:$0xff]  ;;  %v537_v6 = vld [vmem:[#allocation2 + $0x4] ss:$0 sm:$0xff] }
  0x27   :  { %553 = vmatprep.mubr.msk.f32.mxu0 %vm675_vm0, %v674_v0  ;;  %558 = vmatprep.mubr.msk.f32.mxu1 %vm675_vm0, %v674_v0  ;;  %v46_v4 = vadd.f32 %v533_v2, %v39_v1  ;;  %v204_v5 = vadd.f32 %v535_v3, %v39_v1  ;;  %v534_v7 = vld [vmem:[#allocation2 + $0x1] ss:$0 sm:$0xff]  ;;  %v536_v8 = vld [vmem:[#allocation2 + $0x3] ss:$0 sm:$0xff]  ;;  %v362_v10 = vadd.f32 %v537_v6, %v39_v1  ;;  %v538_v12 = vld [vmem:[#allocation2 + $0x5] ss:$0 sm:$0xff] }
  0x28   :  { %v125_v9 = vadd.f32 %v534_v7, %v39_v1  ;;  %v283_v11 = vadd.f32 %v536_v8, %v39_v1  ;;  %v441_v13 = vadd.f32 %v538_v12, %v39_v1  ;;  %v40_v15 = vld [vmem:[%s752_s2] sm:$0xf]  ;;  %vm118_vm1 = vcmask 44032   ;;  %s676_s2 = smov [#allocation7]  }
  0x29   :  { %588 = vtanh.f32 %v46_v4  ;;  %s520_s9 = sshll.u32 %s676_s2, 4  ;;  %s521_s9 = int_to_ptr.vmem [resolvable:$true] %s520_s9 }
  0x2a   :  { %590 = vtanh.f32 %v204_v5  ;;  %s644_s10 = scalar_lea.vmem %s521_s9, 384  ;;  %p649_p3 = scmp.lt.s32.totalorder %s521_s9, %s521_s9 }
  0x2b   :  { %592 = vtanh.f32 %v125_v9  ;;  %p645_p2 = scmp.ne.s32.totalorder %s521_s9, %s644_s10  ;;  %p650_p4 = scmp.lt.s32.totalorder %s644_s10, %s644_s10 }
  0x2c   :  { %594 = vtanh.f32 %v362_v10 }
  0x2d   :  { %596 = vtanh.f32 %v283_v11  ;;  %p651_p5 = por %p650_p4, %p649_p3 }
  0x2e   :  { %598 = vtanh.f32 %v441_v13 }
  0x2f   :  { %p652_p6 = pnand %p651_p5, %p645_p2 }
  0x33   :  { %v589_v14 = vpop.eup %588 }
  0x34   :  { %552 = vmatpush3.xpose.msra.mxu0 %v589_v14  ;;  %v591_v16 = vpop.eup %590 }
  0x35   :  { %561 = vmatprep.subr.mxu0 %v674_v0  ;;  %v593_v17 = vpop.eup %592 }
  0x36   :  { %v595_v18 = vpop.eup %594  ;;  %557 = vmatpush3.xpose.msra.mxu1 %v593_v17 }
  0x37   :  { %554 = vmatmul.mubr.f32.vlgmr.msra.gmra.mrb[0].mxu0 %v40_v15  ;;  %v597_v19 = vpop.eup %596  ;;  %566 = vmatprep.subr.mxu1 %v674_v0 }
  0x38   :  { %562 = vmatpush3.xpose.msra.mxu0 %v591_v16  ;;  %563 = vmatprep.mubr.msk.f32.mxu0 %vm675_vm0, %v674_v0  ;;  %v599_v20 = vpop.eup %598 }
  0x39   :  { %571 = vmatprep.subr.mxu0 %v674_v0  ;;  %559 = vmatmul.mubr.f32.vlgmr.msra.gmra.mrb[0].mxu1 %v40_v15 }
  0x3a   :  { %567 = vmatpush3.xpose.msra.mxu1 %v597_v19  ;;  %568 = vmatprep.mubr.msk.f32.mxu1 %vm675_vm0, %v674_v0 }
  0x3b   :  { %564 = vmatmul.mubr.f32.vlgmr.msra.gmra.mrb[2].mxu0 %v40_v15  ;;  %576 = vmatprep.subr.mxu1 %v674_v0 }
  0x3c   :  { %572 = vmatpush3.xpose.msra.mxu0 %v595_v18  ;;  %573 = vmatprep.mubr.msk.f32.mxu0 %vm675_vm0, %v674_v0 }
  0x3d   :  { %569 = vmatmul.mubr.f32.vlgmr.msra.gmra.mrb[2].mxu1 %v40_v15 }
  0x3e   :  { %577 = vmatpush3.xpose.msra.mxu1 %v599_v20  ;;  %578 = vmatprep.mubr.msk.f32.mxu1 %vm675_vm0, %v674_v0 }
  0x3f   :  { %574 = vmatmul.mubr.f32.vlgmr.msra.gmra.mrb[4].mxu0 %v40_v15 }
  0x41   :  { %579 = vmatmul.mubr.f32.vlgmr.msra.gmra.mrb[4].mxu1 %v40_v15 }
 0x10a   :  { %v114_v21 = vpop.f32.mrb[0].mxu0 }
 0x10b   :  { %119 = vst.msk [vmem:[#allocation7] sm:$0xf] %vm118_vm1, %v114_v21  ;;  %v555_v22 = vpop.f32.mrb[1].mxu0 }
 0x10c   :  { %v193_v24 = vpop.f32.mrb[0].mxu1 }
 0x10d   :  { %198 = vst.msk [vmem:[#allocation7 + $0x4] sm:$0xf] %vm118_vm1, %v193_v24  ;;  %v560_v26 = vpop.f32.mrb[1].mxu1 }
 0x10e   :  { %v272_v23 = vpop.f32.mrb[2].mxu0 }
 0x10f   :  { %277 = vst.msk [vmem:[#allocation7 + $0x8] sm:$0xf] %vm118_vm1, %v272_v23  ;;  %v565_v25 = vpop.f32.mrb[3].mxu0 }
 0x110   :  { %v351_v28 = vpop.f32.mrb[2].mxu1 }
 0x111   :  { %356 = vst.msk [vmem:[#allocation7 + $0xc] sm:$0xf] %vm118_vm1, %v351_v28  ;;  %v570_v30 = vpop.f32.mrb[3].mxu1 }
 0x112   :  { %v430_v27 = vpop.f32.mrb[4].mxu0 }
 0x113   :  { %435 = vst.msk [vmem:[#allocation7 + $0x10] sm:$0xf] %vm118_vm1, %v430_v27  ;;  %v575_v29 = vpop.f32.mrb[5].mxu0 }
 0x114   :  { %v509_v31 = vpop.f32.mrb[4].mxu1 }
 0x115   :  { %514 = vst.msk [vmem:[#allocation7 + $0x14] sm:$0xf] %vm118_vm1, %v509_v31  ;;  %v580_v32 = vpop.f32.mrb[5].mxu1 }
 0x116   :  { %655 = shalt.err (!%p652_p6)
}
 0x117   :  { %s656_s13 = scalar_lea.hbm %s753_s3, 384 }
 0x118   :  { %p657_p7 = scmp.ne.s32.totalorder %s753_s3, %s656_s13  ;;  %p660_p8 = scmp.lt.u32.totalorder %s656_s13, %s753_s3 }
 0x11a   :  { %p662_p9 = pnand %p660_p8, %p657_p7 }
 0x11c   :  { %665 = shalt.err (!%p662_p9)
}
 0x11d   :  { %s677_s18 = smov 64   ;;  %s678_s19 = smov 4  }
 0x11e   :  { %526 = dma.vmem_to_hbm [thread:$0]  %s521_s9, 384, %s753_s3, [#allocation4], %s677_s18, %s677_s18, %s678_s19  }
 0x11f   :  { %670 = dma.done.wait [#allocation4], 384  }
 0x120   :  { %671 = vsyncadd [#allocation4], 4294966912 }
 0x121   :  { %530 = vsyncpa [#allocation3], 1 }
 0x122   :  { %531 = vsyncpa [#allocation6], 1 }
 0x123   :  { %532 = vsyncpa [#allocation4], 1 }

</bundles_post_ra>
